<compile_context>
chip_gen: v5e
topology: v5e:2x2
jax: 0.10.0
libtpu: 0.0.40
codegen_flags: <defaults>
</compile_context>

<pallas_src>
import functools
import math

import jax
import jax.numpy as jnp
from jax.experimental import pallas as pl
from jax.experimental.pallas import tpu as pltpu


_LANE = 128
# Packed-sublane quantum (rows per native (sublane, 128) tile), keyed by itemsize.
_SUBLANE_Q = {1: 32, 2: 16, 4: 8}
# Below this block size a large problem is better served by XLA's concat+clip
# (per-step grid overhead would dominate the DMA).
_MIN_USEFUL_BLOCK_BYTES = 512 * 1024
_SMALL_TOTAL_BYTES = 8 * 1024 * 1024


def _cdiv(a: int, b: int) -> int:
    return -(-a // b)


def _clamp_bounds(quantization_mode: str, xb: int = 8):
    """Clamp bounds matching clamping_qa / clamping_hw (xb=8, wide=False)."""
    if quantization_mode in ("fpt", "qat"):
        return -1.0, float(2 ** (xb - 1) - 1) / float(2 ** (xb - 1))   # [-1, 127/128]
    if quantization_mode == "eval":
        return -float(2 ** (xb - 1)), float(2 ** (xb - 1) - 1)         # [-128, 127]
    if quantization_mode == "fpt_unconstrained":
        return None, None
    raise ValueError(
        "wrong quantization mode. should be one of "
        "{fpt_unconstrained, fpt, qat, eval}")


def _clip(v, lo, hi):
    """Clip with bounds cast to the value dtype (keeps int dtypes int)."""
    return jnp.clip(v, jnp.asarray(lo, v.dtype), jnp.asarray(hi, v.dtype))


@functools.lru_cache(maxsize=None)
def _vmem_config():
    """(block_budget_bytes, vmem_limit_bytes) — conservative if the query fails."""
    block_budget, vmem_limit = 4 << 20, 48 << 20       # safe on v7x (64 MiB / TC)
    try:
        cap = pltpu.get_tpu_info().vmem_capacity_bytes
        if cap >= (96 << 20):                          # v5e / v6e: 128 MiB VMEM
            block_budget, vmem_limit = 8 << 20, 64 << 20
    except Exception:
        pass
    return block_budget, vmem_limit


# ----------------------------------------------------------------------------
# Kernel
# ----------------------------------------------------------------------------
def _concat_clamp_kernel(x1_ref, x2_ref, o_ref, *, nb1, lo, hi):
    """Row steps [0, nb1) write clamped x1 blocks; [nb1, ...) write x2 blocks."""
    i = pl.program_id(1)

    @pl.when(i < nb1)
    def _():
        o_ref[...] = _clip(x1_ref[...], lo, hi)

    @pl.when(i >= nb1)
    def _():
        o_ref[...] = _clip(x2_ref[...], lo, hi)


# ----------------------------------------------------------------------------
# Tiling selection
# ----------------------------------------------------------------------------
def _pick_tiling(s1r: int, s2r: int, B: int, itemsize: int, block_budget: int):
    """Pick (lane, tb, tbb, rows1, rows2, nb1, nb2, block_bytes, nblocks).

    Requirements:  lane % 128 == 0, lane | s1r, lane | s2r (so the per-B slices
    reshape losslessly), tb a multiple of the packed-sublane quantum dividing
    rows1 (x1/x2 boundary alignment), tbb a divisor of B.  x2's tail block is
    ragged and relies on Pallas edge masking.  Returns None if no tiling.
    """
    q = _SUBLANE_Q.get(itemsize)
    if q is None:
        return None
    best = None
    for lane in (128, 256, 512, 1024):
        if s1r % lane or s2r % lane:
            continue
        rows1, rows2 = s1r // lane, s2r // lane
        if rows1 % q:
            continue
        row_cap = max(q, (block_budget // (lane * itemsize)) // q * q)
        tb_cands = [t for t in range(q, min(rows1, row_cap) + 1, q)
                    if rows1 % t == 0]
        # Prefer the largest row block, widen across B to fill the budget, then
        # shrink (B width first, row block second) until the grid has >= 4
        # blocks so both v7x TensorCores get balanced work.
        for tb in sorted(tb_cands, reverse=True):
            nb1, nb2 = rows1 // tb, _cdiv(rows2, tb)
            cap_b = max(1, block_budget // (tb * lane * itemsize))
            tbb = max(t for t in range(1, min(B, cap_b) + 1) if B % t == 0)
            while (B // tbb) * (nb1 + nb2) < 4 and tbb > 1:
                tbb = max(t for t in range(1, tbb) if B % t == 0)
            nblocks = (B // tbb) * (nb1 + nb2)
            block_bytes = tbb * tb * lane * itemsize
            cand = (lane, tb, tbb, rows1, rows2, nb1, nb2, block_bytes, nblocks)
            key = (nblocks >= 4, block_bytes)
            if best is None or key > best[0]:
                best = (key, cand)
            if nblocks >= 4:
                break  # smaller tb only shrinks blocks further
    return None if best is None else best[1]


# ----------------------------------------------------------------------------
# Public wrapper (== concatenate.forward)
# ----------------------------------------------------------------------------
def concatenate_forward(x1: jax.Array, x2: jax.Array, *, dim: int = 0,
                        quantization_mode: str = "fpt") -> jax.Array:
    """clamp(concat([x1, x2], dim)) with mode-dependent 8-bit clamp bounds."""
    lo, hi = _clamp_bounds(quantization_mode)

    if x1.ndim == 0 or x1.ndim != x2.ndim:
        raise ValueError("x1 and x2 must have the same (non-zero) rank")
    d = dim % x1.ndim
    if (x1.shape[:d] + x1.shape[d + 1:]) != (x2.shape[:d] + x2.shape[d + 1:]):
        raise ValueError("all non-concatenation dims of x1 and x2 must match")

    dtype = jnp.result_type(x1.dtype, x2.dtype)
    if (lo is not None and quantization_mode in ("fpt", "qat")
            and not jnp.issubdtype(dtype, jnp.floating)):
        # Fractional clamp bounds need a float dtype (matches QAT float activations).
        dtype = jnp.dtype(jnp.float32)
    x1 = x1.astype(dtype)
    x2 = x2.astype(dtype)

    # No-clamp mode: a Pallas copy would only add an extra HBM pass; XLA's
    # concatenate can fuse into consumers or avoid the copy via layout.
    if lo is None:
        return jnp.concatenate([x1, x2], axis=d)

    # Empty inputs: avoid zero-sized grids / negative clamped block indices.
    if x1.size == 0 or x2.size == 0:
        return _clip(jnp.concatenate([x1, x2], axis=d), lo, hi)

    R1, R2 = x1.shape[d], x2.shape[d]
    out_shape = x1.shape[:d] + (R1 + R2,) + x1.shape[d + 1:]
    B = math.prod(x1.shape[:d])
    C = math.prod(x1.shape[d + 1:])
    s1r, s2r = R1 * C, R2 * C                     # per-B contiguous slice sizes
    itemsize = dtype.itemsize

    block_budget, vmem_limit = _vmem_config()
    tiling = _pick_tiling(s1r, s2r, B, itemsize, block_budget)

    total_bytes = (x1.size + x2.size) * itemsize
    if tiling is None or (tiling[7] < _MIN_USEFUL_BLOCK_BYTES
                          and total_bytes > _SMALL_TOTAL_BYTES):
        # TODO(synk): shapes with no 128-lane-aligned per-B slice (or only
        # degenerate tiny blocks) use the XLA concat+clip, which is already a
        # near-roofline bandwidth-bound fused copy.
        return _clip(jnp.concatenate([x1, x2], axis=d), lo, hi)

    lane, tb, tbb, rows1, rows2, nb1, nb2, _, _ = tiling

    # Copy-free views: concat dim left in place, trailing dims folded into a
    # lane-dense last axis.
    a = x1.reshape(B, rows1, lane)
    b = x2.reshape(B, rows2, lane)

    out3 = pl.pallas_call(
        functools.partial(_concat_clamp_kernel, nb1=nb1, lo=lo, hi=hi),
        out_shape=jax.ShapeDtypeStruct((B, rows1 + rows2, lane), dtype),
        grid=(B // tbb, nb1 + nb2),
        in_specs=[
            # Clamp the inactive input's block index so each input block is
            # DMA'd from HBM exactly once over the whole grid.
            pl.BlockSpec((tbb, tb, lane),
                         lambda bb, i: (bb, jnp.minimum(i, nb1 - 1), 0)),
            pl.BlockSpec((tbb, tb, lane),
                         lambda bb, i: (bb, jnp.maximum(i - nb1, 0), 0)),
        ],
        out_specs=pl.BlockSpec((tbb, tb, lane), lambda bb, i: (bb, i, 0)),
        compiler_params=pltpu.CompilerParams(
            dimension_semantics=("parallel", "parallel"),
            vmem_limit_bytes=vmem_limit,
        ),
    )(a, b)

    return out3.reshape(out_shape)


# ----------------------------------------------------------------------------
# Self-test
# ----------------------------------------------------------------------------
if __name__ == "__main__":
    key = jax.random.PRNGKey(0)
    k1, k2, k3, k4, k5 = jax.random.split(key, 5)
    x1 = jax.random.normal(k1, (2, 4, 16, 16), dtype=jnp.float32)
    x2 = jax.random.normal(k2, (2, 4, 16, 16), dtype=jnp.float32) * 2.0

    # Default module config: dim=0, 'fpt' -> clamp to [-1, 127/128].
    out = jax.block_until_ready(concatenate_forward(x1, x2, dim=0,
                                                    quantization_mode="fpt"))
    ref = _clip(jnp.concatenate([x1, x2], axis=0), -1.0, 127.0 / 128.0)
    assert out.shape == (4, 4, 16, 16), out.shape
    assert jnp.array_equal(out, ref), "fpt/dim=0 mismatch"

    # 'eval' (hardware) mode clamps to [-128, 127].
    x1b, x2b = x1 * 300.0, x2 * 300.0
    out_eval = jax.block_until_ready(
        concatenate_forward(x1b, x2b, dim=0, quantization_mode="eval"))
    ref_eval = _clip(jnp.concatenate([x1b, x2b], axis=0), -128.0, 127.0)
    assert jnp.array_equal(out_eval, ref_eval), "eval mismatch"

    # Channel concat (dim=1): copy-free fast path, no moveaxis.
    out_d1 = jax.block_until_ready(
        concatenate_forward(x1, x2, dim=1, quantization_mode="qat"))
    ref_d1 = _clip(jnp.concatenate([x1, x2], axis=1), -1.0, 127.0 / 128.0)
    assert out_d1.shape == (2, 8, 16, 16), out_d1.shape
    assert jnp.array_equal(out_d1, ref_d1), "qat/dim=1 mismatch"

    # bf16 exercises the 16-row packed-sublane block height.
    xb1 = jax.random.normal(k3, (2, 8, 16, 16), dtype=jnp.bfloat16)
    xb2 = jax.random.normal(k4, (2, 8, 16, 16), dtype=jnp.bfloat16)
    out_bf = jax.block_until_ready(
        concatenate_forward(xb1, xb2, dim=1, quantization_mode="fpt"))
    ref_bf = _clip(jnp.concatenate([xb1, xb2], axis=1), -1.0, 127.0 / 128.0)
    assert jnp.array_equal(out_bf, ref_bf), "fpt/bf16 mismatch"

    # Unequal concat sizes exercise the masked ragged x2 tail block.
    xr2 = jax.random.normal(k5, (2, 12, 16, 16), dtype=jnp.float32)
    xr1 = jax.random.normal(k3, (2, 8, 16, 16), dtype=jnp.float32)
    out_rag = jax.block_until_ready(
        concatenate_forward(xr1, xr2, dim=1, quantization_mode="qat"))
    ref_rag = _clip(jnp.concatenate([xr1, xr2], axis=1), -1.0, 127.0 / 128.0)
    assert out_rag.shape == (2, 20, 16, 16), out_rag.shape
    assert jnp.array_equal(out_rag, ref_rag), "ragged-tail mismatch"

    # Integer inputs in 'eval' mode keep their dtype (integer clamp bounds).
    xi1 = jax.random.randint(k1, (2, 4, 16, 16), -300, 300, dtype=jnp.int32)
    xi2 = jax.random.randint(k2, (2, 4, 16, 16), -300, 300, dtype=jnp.int32)
    out_int = jax.block_until_ready(
        concatenate_forward(xi1, xi2, dim=1, quantization_mode="eval"))
    ref_int = jnp.clip(jnp.concatenate([xi1, xi2], axis=1), -128, 127)
    assert out_int.dtype == jnp.int32 and jnp.array_equal(out_int, ref_int), \
        "eval/int32 mismatch"

    # 'fpt_unconstrained' is a plain concat (no Pallas pass).
    out_u = jax.block_until_ready(
        concatenate_forward(x1, x2, dim=1, quantization_mode="fpt_unconstrained"))
    assert jnp.array_equal(out_u, jnp.concatenate([x1, x2], axis=1)), \
        "fpt_unconstrained mismatch"

    # Last-dim concat (lane-unaligned slices) exercises the XLA fallback.
    out_last = jax.block_until_ready(
        concatenate_forward(x1, x2, dim=-1, quantization_mode="qat"))
    ref_last = _clip(jnp.concatenate([x1, x2], axis=-1), -1.0, 127.0 / 128.0)
    assert jnp.array_equal(out_last, ref_last), "fallback/dim=-1 mismatch"

    print("KERNEL_OK")
</pallas_src>

<mosaic_0001>
module attributes {stable_mosaic.version = 11 : i64} {
  func.func @_concat_clamp_kernel(%arg0: i32, %arg1: i32, %arg2: memref<1x8x128xf32, #tpu.memory_space<vmem>>, %arg3: memref<1x8x128xf32, #tpu.memory_space<vmem>>, %arg4: memref<1x8x128xf32, #tpu.memory_space<vmem>>) attributes {dimension_semantics = [#tpu.dimension_semantics<parallel>, #tpu.dimension_semantics<parallel>], iteration_bounds = array<i64: 1, 4>, scalar_prefetch = 0 : i64, scratch_operands = 0 : i64, tpu.core_type = #tpu.core_type<tc>, window_params = [{transform_indices = @transform_0, window_bounds = array<i64: 1, 8, 128>}, {transform_indices = @transform_1, window_bounds = array<i64: 1, 8, 128>}, {transform_indices = @transform_2, window_bounds = array<i64: 1, 8, 128>}]} {
    %c2_i32 = arith.constant 2 : i32
    %0 = arith.cmpi slt, %arg1, %c2_i32 : i32
    %1 = arith.extui %0 : i1 to i32
    %c0_i32 = arith.constant 0 : i32
    %2 = arith.cmpi ne, %1, %c0_i32 : i32
    scf.if %2 {
      %c0 = arith.constant 0 : index
      %c0_2 = arith.constant 0 : index
      %c0_3 = arith.constant 0 : index
      %6 = vector.load %arg2[%c0, %c0_2, %c0_3] : memref<1x8x128xf32, #tpu.memory_space<vmem>>, vector<1x8x128xf32>
      %cst = arith.constant -1.000000e+00 : f32
      %cst_4 = arith.constant 0.9921875 : f32
      %7 = vector.broadcast %cst : f32 to vector<1x8x128xf32>
      %8 = arith.maximumf %7, %6 : vector<1x8x128xf32>
      %9 = vector.broadcast %cst_4 : f32 to vector<1x8x128xf32>
      %10 = arith.minimumf %9, %8 : vector<1x8x128xf32>
      %c0_5 = arith.constant 0 : index
      %c0_6 = arith.constant 0 : index
      %c0_7 = arith.constant 0 : index
      %11 = vector.load %arg4[%c0_5, %c0_6, %c0_7] : memref<1x8x128xf32, #tpu.memory_space<vmem>>, vector<1x8x128xf32>
      tpu.vector_store %arg4[%c0_5, %c0_6, %c0_7], %10 {strides = array<i32>} : memref<1x8x128xf32, #tpu.memory_space<vmem>>, vector<1x8x128xf32>,
    } else {
    }
    %c2_i32_0 = arith.constant 2 : i32
    %3 = arith.cmpi sge, %arg1, %c2_i32_0 : i32
    %4 = arith.extui %3 : i1 to i32
    %c0_i32_1 = arith.constant 0 : i32
    %5 = arith.cmpi ne, %4, %c0_i32_1 : i32
    scf.if %5 {
      %c0 = arith.constant 0 : index
      %c0_2 = arith.constant 0 : index
      %c0_3 = arith.constant 0 : index
      %6 = vector.load %arg3[%c0, %c0_2, %c0_3] : memref<1x8x128xf32, #tpu.memory_space<vmem>>, vector<1x8x128xf32>
      %cst = arith.constant -1.000000e+00 : f32
      %cst_4 = arith.constant 0.9921875 : f32
      %7 = vector.broadcast %cst : f32 to vector<1x8x128xf32>
      %8 = arith.maximumf %7, %6 : vector<1x8x128xf32>
      %9 = vector.broadcast %cst_4 : f32 to vector<1x8x128xf32>
      %10 = arith.minimumf %9, %8 : vector<1x8x128xf32>
      %c0_5 = arith.constant 0 : index
      %c0_6 = arith.constant 0 : index
      %c0_7 = arith.constant 0 : index
      %11 = vector.load %arg4[%c0_5, %c0_6, %c0_7] : memref<1x8x128xf32, #tpu.memory_space<vmem>>, vector<1x8x128xf32>
      tpu.vector_store %arg4[%c0_5, %c0_6, %c0_7], %10 {strides = array<i32>} : memref<1x8x128xf32, #tpu.memory_space<vmem>>, vector<1x8x128xf32>,
    } else {
    }
    return
  }
  func.func @transform_0(%arg0: i32, %arg1: i32) -> (i32, i32, i32) {
    %c1_i32 = arith.constant 1 : i32
    %0 = arith.minsi %arg1, %c1_i32 : i32
    %c0_i32 = arith.constant 0 : i32
    %c0_i32_0 = arith.constant 0 : i32
    return %arg0, %0, %c0_i32 : i32, i32, i32
  }
  func.func @transform_1(%arg0: i32, %arg1: i32) -> (i32, i32, i32) {
    %c2_i32 = arith.constant 2 : i32
    %0 = arith.subi %arg1, %c2_i32 : i32
    %c0_i32 = arith.constant 0 : i32
    %1 = arith.maxsi %0, %c0_i32 : i32
    %c0_i32_0 = arith.constant 0 : i32
    %c0_i32_1 = arith.constant 0 : i32
    return %arg0, %1, %c0_i32_0 : i32, i32, i32
  }
  func.func @transform_2(%arg0: i32, %arg1: i32) -> (i32, i32, i32) {
    %c0_i32 = arith.constant 0 : i32
    %c0_i32_0 = arith.constant 0 : i32
    return %arg0, %arg1, %c0_i32 : i32, i32, i32
  }
}

</mosaic_0001>

<bundles_post_ra>
// kernel: tpu_custom_call.1
= control target key start
LH: loop header
LB: loop body
LE: loop exit
PB: predicated region body
PF: predicated region fallthrough
CT: control target
= control target key end

     0   :  { %s947_s0 = inlined_call_operand.hbm [shape: f32[1,16,128], index: 0, kind: input, shape index: {}]   ;;  %s948_s1 = inlined_call_operand.hbm [shape: f32[1,16,128], index: 1, kind: input, shape index: {}]   ;;  %s949_s2 = inlined_call_operand.hbm [shape: f32[1,32,128], index: 2, kind: output, shape index: {}]  }
   0x1   :  { %954 = sst [smem:[#allocation15_spill]] %s947_s0 }
   0x2   :  { %7 = vsyncpa [#allocation3], 0 }
   0x3   :  { %9 = vsyncpa [#allocation3 + $0x1], 0 }
   0x4   :  { %10 = vsyncpa [#allocation6], 0 }
   0x5   :  { %12 = vsyncpa [#allocation6 + $0x1], 0 }
   0x6   :  { %13 = vsyncpa [#allocation4], 0 }
   0x7   :  { %15 = vsyncpa [#allocation4 + $0x1], 0  ;;  %s730_s9 = smov 0   ;;  %s732_s10 = smov 0  }
   0x8   :  { %s734_s11 = smov 0   ;;  %s736_s12 = smov 0  }
   0x9   :  { %s738_s13 = smov 0   ;;  %s740_s14 = smov 0  }
   0xa   :  { %s742_s15 = smov 0   ;;  %s744_s16 = smov 0  }
   0xb   :  { %s746_s17 = smov 0   ;;  %s748_s18 = smov 0  }
   0xc   :  { %s750_s19 = smov 0   ;;  %s752_s20 = smov 0  }
   0xd LB: > { %955 = sst [smem:[#allocation11_spill]] %s701_s17  ;;  %s383_s21 = sadd.s32 4294967295, %s713_s20   ;;  %s713_s20 = sphi %s752_s20, %s21_s20   ;;  %s709_s19 = sphi %s750_s19, %s971_s19   ;;  %s705_s18 = sphi %s748_s18, %s970_s18   ;;  %s701_s17 = sphi %s746_s17, %s969_s17   ;;  %s697_s16 = sphi %s744_s16, %s979_s16   ;;  %s693_s15 = sphi %s742_s15, %s978_s15   ;;  %s689_s14 = sphi %s740_s14, %s977_s14   ;;  %s685_s13 = sphi %s738_s13, %s976_s13   ;;  %s681_s12 = sphi %s736_s12, %s975_s12   ;;  %s677_s11 = sphi %s734_s11, %s974_s11   ;;  %s673_s10 = sphi %s732_s10, %s973_s10   ;;  %s669_s9 = sphi %s730_s9, %s972_s9  }
   0xe   : > { %956 = sst [smem:[#allocation12_spill]] %s709_s19  ;;  %s384_s22 = sadd.s32 4294967294, %s713_s20  }
   0xf   : > { %s30_s23 = sadd.s32 1, %s709_s19  ;;  %p37_p0 = scmp.lt.s32.totalorder %s709_s19, 1 }
  0x10   : > { %p31_p1 = scmp.ge.s32.totalorder %s30_s23, 4  ;;  %s46_s24 = sadd.s32 1, %s701_s17 }
  0x11   : > { %s38_s25 = scalar_select %p37_p0, %s709_s19, 1 }
  0x12   : > { %s981_s23 = smov (%p31_p1, %s30_s23), 0  ;;  %p53_p2 = scmp.ne.s32.totalorder %s701_s17, %s697_s16 }
  0x13   : > { %957 = sst [smem:[#allocation13_spill]] %s981_s23  ;;  %p54_p3 = scmp.eq.s32.totalorder %s713_s20, 0 }
  0x14   : > { %p39_p4 = scmp.lt.s32.totalorder %s981_s23, 1  ;;  %p59_p5 = scmp.ne.s32.totalorder %s697_s16, %s693_s15 }
  0x15   : > { %p803_p6 = por %p54_p3, %p53_p2  ;;  %p807_p7 = scmp.eq.s32.totalorder %s383_s21, 0 }
  0x16   : > { %s40_s28 = scalar_select %p39_p4, %s981_s23, 1 }
  0x17   : > { %p814_p8 = por %p807_p7, %p59_p5  ;;  %s104_s30 = ssub.s32 %s709_s19, %s981_s23 }
  0x18   : > { %s42_s3 = ssub.s32 %s38_s25, %s40_s28  ;;  %p106_p9 = scmp.eq.s32.totalorder %s104_s30, 0 }
  0x19   : > { %p44_p10 = scmp.eq.s32.totalorder %s42_s3, 0  ;;  %s108_s4 = sadd.s32 1, %s677_s11 }
  0x1a   : > { %s822_s5 = scalar_select %p106_p9, %s677_s11, %s108_s4  }
  0x1b   : > { %s825_s6 = scalar_select %p44_p10, %s701_s17, %s46_s24  }
  0x1c   : > { %p118_p11 = scmp.ne.s32.totalorder %s677_s11, %s673_s10  ;;  %p119_p12 = scmp.eq.s32.totalorder %s383_s21, 3 }
  0x1d   : > { %961 = sst [smem:[#allocation14_spill]] %s825_s6  ;;  %p124_p13 = scmp.ne.s32.totalorder %s673_s10, %s669_s9 }
  0x1e   : > { %p125_p0 = scmp.eq.s32.totalorder %s384_s22, 3  ;;  %p831_p1 = por %p119_p12, %p118_p11 }
  0x1f   : > { %p950_p4 = scmp.lt.s32.totalorder %s713_s20, 4  ;;  %s145_s15 = sand.u32 1, %s701_s17  }
  0x20   : > { %p835_p2 = por %p125_p0, %p124_p13  ;;  %s390_s24 = sshll.u32 %s38_s25, 3 }
  0x21   : > { %s389_s28 = sshll.u32 %s145_s15, 3  ;;  %s964_s0 = sld [smem:[#allocation15_spill]] }
  0x22   : > { %s149_s22 = scalar_lea.vmem [#allocation2], %s389_s28  ;;  %p411_p5 = pnand %p950_p4, %p803_p6 }
  0x23   : > { %s161_s6 = sshll.u32 %s149_s22, 4  ;;  %p394_p9 = scmp.ge.s32.totalorder %s713_s20, 1  ;;  %s162_s6 = int_to_ptr.vmem [resolvable:$true] %s161_s6 }
  0x24   : > { %p190_p10 = scmp.lt.s32.totalorder %s713_s20, 5  ;;  %s146_s25 = scalar_lea.sflag [#allocation3], %s145_s15 }
  0x25   : > { %s385_s28 = sadd.s32 4294967294, %s709_s19  ;;  %s386_s30 = sadd.s32 4294967294, %s981_s23 }
  0x26   : > { %p850_p11 = pnand %p394_p9, %p190_p10  ;;  %p70_p12 = scmp.gt.s32.totalorder %s385_s28, 0 }
  0x27   : > { %s157_s3 = scalar_lea.hbm %s964_s0, %s390_s24  ;;  %p73_p13 = scmp.gt.s32.totalorder %s386_s30, 0 }
  0x28   : > { %s159_s4 = sshll.u32 %s157_s3, 4  ;;  %s983_s28 = smov (!%p70_p12, %s385_s28), 0  ;;  %s160_s4 = int_to_ptr.hbm [resolvable:$true] %s159_s4 }
  0x29   : > { %413 = dma.hbm_to_vmem [thread:$0]  (!%p411_p5), %s160_s4, 128, %s162_s6, %s146_s25  }
  0x2a   : > { %s985_s30 = smov (!%p73_p13, %s386_s30), 0  ;;  %p87_p0 = scmp.ne.s32.totalorder %s689_s14, %s685_s13 }
  0x2b   : > { %p93_p6 = scmp.ne.s32.totalorder %s685_s13, %s681_s12  ;;  %s76_s26 = ssub.s32 %s983_s28, %s985_s30 }
  0x2c   : > { %s80_s21 = sadd.s32 1, %s689_s14  ;;  %p78_p4 = scmp.eq.s32.totalorder %s76_s26, 0 }
  0x2d   : > { %s168_s15 = sand.u32 1, %s689_s14   ;;  %p89_p5 = por %p87_p0, %p54_p3 }
  0x2e   : > { %p866_p9 = por %p93_p6, %p807_p7  ;;  %s391_s4 = sshll.u32 %s168_s15, 3 }
  0x2f   : > { %s871_s3 = scalar_select %p78_p4, %s689_s14, %s80_s21  }
  0x30   : > { %s393_s22 = sshll.u32 %s983_s28, 3  ;;  %s172_s30 = scalar_lea.vmem [#allocation5], %s391_s4 }
  0x31   : > { %s181_s12 = scalar_lea.hbm %s948_s1, %s393_s22  ;;  %s185_s19 = sshll.u32 %s172_s30, 4  ;;  %s186_s19 = int_to_ptr.vmem [resolvable:$true] %s185_s19 }
  0x32   : > { %s183_s23 = sshll.u32 %s181_s12, 4  ;;  %p967_p10 = scmp.lt.s32.totalorder %s713_s20, 4  ;;  %s184_s23 = int_to_ptr.hbm [resolvable:$true] %s183_s23 }
  0x33   : > { %s169_s27 = scalar_lea.sflag [#allocation6], %s168_s15  ;;  %194 = sbr.rel (%p850_p11) target bundleno = 102 (0x66), region = 28 }
  0x34   : > { %p414_p3 = pnand %p967_p10, %p89_p5  ;;  %s196_s26 = sand.u32 (!%p850_p11), 1, %s697_s16  }
  0x35   : > { %s395_s28 = sshll.u32 (!%p850_p11), %s196_s26, 3  ;;  %s197_s21 = scalar_lea.sflag (!%p850_p11), [#allocation3], %s196_s26 }
  0x36   : > { %416 = dma.hbm_to_vmem [thread:$0]  (!%p414_p3), %s184_s23, 128, %s186_s19, %s169_s27  }
  0x37   : > { %s200_s17 = scalar_lea.vmem (!%p850_p11), [#allocation2], %s395_s28 }
  0x38   : > { %656 = dma.done.wait (%p814_p8), %s197_s21, 128  }
  0x39   : > { %658 = vsyncadd (%p814_p8), %s197_s21, 4294967168  ;;  %s206_s0 = sand.u32 1, %s685_s13  }
  0x3a   : > { %s396_s4 = sshll.u32 %s206_s0, 3  ;;  %s207_s15 = scalar_lea.sflag [#allocation6], %s206_s0 }
  0x3b   : > { %s210_s19 = scalar_lea.vmem [#allocation5], %s396_s4 }
  0x3c   : > { %660 = dma.done.wait (%p866_p9), %s207_s15, 128  }
  0x3d   : > { %662 = vsyncadd (%p866_p9), %s207_s15, 4294967168  ;;  %s234_s23 = sand.u32 1, %s673_s10   ;;  %p398_p7 = scmp.ge.s32.totalorder %s705_s18, 2 }
  0x3e   : > { %s397_s24 = sshll.u32 %s234_s23, 3 }
  0x3f   : > { %s236_s22 = scalar_lea.vmem [#allocation7], %s397_s24  ;;  %245 = sbr.rel (%p398_p7) target bundleno = 74 (0x4a), region = 40 }
  0x44   : > { %v246_v0 = vld [vmem:[%s200_s17] sm:$0xff] }
  0x45   : > { %v247_v1 = vmax.f32 %v246_v0, -1.0 }
  0x47   : > { %v248_v2 = vmin.f32 %v247_v1, 0.9921875 }
  0x49   : > { %249 = vst [vmem:[%s236_s22] sm:$0xff] %v248_v2 }
  0x4a PF: > { %p399_p8 = scmp.lt.s32.totalorder %s705_s18, 2 }
  0x4c   : > { %253 = sbr.rel (%p399_p8) target bundleno = 87 (0x57), region = 44 }
  0x51   : > { %v254_v3 = vld [vmem:[%s210_s19] sm:$0xff] }
  0x52   : > { %v255_v4 = vmax.f32 %v254_v3, -1.0 }
  0x54   : > { %v256_v5 = vmin.f32 %v255_v4, 0.9921875 }
  0x56   : > { %257 = vst [vmem:[%s236_s22] sm:$0xff] %v256_v5 }
  0x57 PF: > { %s401_s29 = sshll.u32 %s705_s18, 3  ;;  %s273_s17 = sshll.u32 %s236_s22, 4  ;;  %s274_s17 = int_to_ptr.vmem [resolvable:$true] %s273_s17 }
  0x58   : > { %s271_s12 = scalar_lea.hbm %s949_s2, %s401_s29  ;;  %s259_s27 = scalar_lea.sflag [#allocation4], %s234_s23 }
  0x59   : > { %s275_s30 = sshll.u32 %s271_s12, 4  ;;  %s599_s18 = scalar_lea.hbm %s949_s2, 32  ;;  %s276_s30 = int_to_ptr.hbm [resolvable:$true] %s275_s30 }
  0x5a   : > { %s593_s26 = sshra.s32 %s276_s30, 4  ;;  %s594_s26 = int_to_ptr.hbm [resolvable:$true] %s593_s26 }
  0x5b   : > { %s595_s28 = scalar_lea.hbm %s594_s26, 8  ;;  %p600_p13 = scmp.lt.s32.totalorder %s594_s26, %s949_s2 }
  0x5c   : > { %p596_p4 = scmp.ne.s32.totalorder %s594_s26, %s595_s28  ;;  %p601_p0 = scmp.lt.s32.totalorder %s599_s18, %s595_s28 }
  0x5e   : > { %p597_p11 = pnand %p596_p4, %p831_p1  ;;  %p602_p6 = por %p601_p0, %p600_p13 }
  0x60   : > { %p598_p12 = pneg %p597_p11 }
  0x62   : > { %p603_p5 = pnand %p602_p6, %p598_p12 }
  0x64   : > { %606 = shalt.err (!%p603_p5)
}
  0x65   : > { %408 = dma.vmem_to_hbm [thread:$0]  (%p831_p1), %s274_s17, 128, %s276_s30, %s259_s27  }
  0x66 PF: > { %p422_p9 = scmp.ge.s32.totalorder %s713_s20, 2  ;;  %s287_s19 = sand.u32 1, %s669_s9  }
  0x67   : > { %s288_s23 = scalar_lea.sflag [#allocation4], %s287_s19 }
  0x68   : > { %p418_p10 = pnand %p422_p9, %p835_p2 }
  0x6a   : > { %p419_p3 = pneg %p418_p10 }
  0x6c   : > { %664 = dma.done.wait (%p419_p3), %s288_s23, 128  }
  0x6d   : > { %666 = vsyncadd (%p419_p3), %s288_s23, 4294967168  ;;  %s21_s20 = sadd.s32 1, %s713_s20   ;;  %s968_s7 = sld [smem:[#allocation11_spill]] }
  0x6e   : > { %p18_p7 = scmp.ge.s32.totalorder %s21_s20, 6   ;;  %s969_s17 = sld [smem:[#allocation14_spill]] }
  0x6f   : > { %s970_s18 = sld [smem:[#allocation12_spill]]  ;;  %s972_s9 = smov %s673_s10 }
  0x70   : > { %s971_s19 = sld [smem:[#allocation13_spill]]  ;;  %s973_s10 = smov %s677_s11 }
  0x71   : > { %s974_s11 = smov %s822_s5  ;;  %s975_s12 = smov %s685_s13 }
  0x72   : > { %s976_s13 = smov %s689_s14  ;;  %s977_s14 = smov %s871_s3 }
  0x73   : > { %s978_s15 = smov %s697_s16  ;;  %s979_s16 = smov %s968_s7 }
  0x74   :  { %20 = sbr.rel (!%p18_p7) target bundleno = 13 (0xd), region = 94 }
  0x79   :  { %294 = vsyncpa [#allocation3], 1 }
  0x7a   :  { %296 = vsyncpa [#allocation3 + $0x1], 1 }
  0x7b   :  { %297 = vsyncpa [#allocation6], 1 }
  0x7c   :  { %299 = vsyncpa [#allocation6 + $0x1], 1 }
  0x7d   :  { %300 = vsyncpa [#allocation4], 1 }
  0x7e   :  { %302 = vsyncpa [#allocation4 + $0x1], 1 }

</bundles_post_ra>
